<compile_context>
chip_gen: v7x
topology: tpu7x:2x2x1
jax: 0.10.0
libtpu: 0.0.40
codegen_flags: <defaults>
</compile_context>

<pallas_src>
import functools

import jax
import jax.numpy as jnp
import numpy as np
from jax.experimental import pallas as pl
from jax.experimental.pallas import tpu as pltpu


# --------------------------------------------------------------------------
# Helpers
# --------------------------------------------------------------------------
def _round_up(c, m=128):
    return ((c + m - 1) // m) * m


def _shift_rows(x, s):
    """y[l] = x[l - s] for 0 <= l - s < L, else 0 (the conv's zero padding).

    s != 0; works on the bf16 activation directly.
    """
    L = x.shape[0]
    zeros = jnp.zeros((abs(s),) + x.shape[1:], x.dtype)
    if s > 0:
        return jnp.concatenate([zeros, x[:L - s]], axis=0)
    return jnp.concatenate([x[-s:], zeros], axis=0)


def _pick_vmem_limit():
    """Generation-aware scoped-VMEM limit (~75% of physical per-core VMEM)."""
    try:
        cap = int(pltpu.get_tpu_info().vmem_capacity_bytes)
        return int(min(max(cap * 3 // 4, 32 * 1024 * 1024), 100 * 1024 * 1024))
    except Exception:
        return 48 * 1024 * 1024


# --------------------------------------------------------------------------
# Fused kernel: [mask -> conv1d(same) -> ReLU -> LayerNorm -> mask] x N
#               -> Linear(C, 1) -> masked_fill(-inf)
# --------------------------------------------------------------------------
def _fused_kernel(*refs, num_layers, kernel_size, cout_real, eps):
    x_ref, keep_ref = refs[0], refs[1]
    blk = refs[2:2 + 4 * num_layers]
    fcw_ref = refs[2 + 4 * num_layers]
    fcb_ref = refs[3 + 4 * num_layers]
    o_ref = refs[4 + 4 * num_layers]

    K = kernel_size
    pad_l = (K - 1) // 2

    keep = keep_ref[...]                        # (L, 1) f32: 1 = valid, 0 = pad
    keep_bf = keep.astype(jnp.bfloat16)

    # Mask the raw input once (layers i>0 are already masked at layer end).
    h_bf = x_ref[...] * keep_bf                 # (L, Cin0_pad) bf16
    h_f32 = h_bf.astype(jnp.float32)            # only used if num_layers == 0

    for i in range(num_layers):
        w_ref, b_ref, g_ref, be_ref = blk[4 * i:4 * i + 4]
        cpad = w_ref.shape[-1]                  # lane-padded out channels
        cr = cout_real[i]                       # real out channels (for LN)

        # Conv1d("same") as K accumulated MXU matmuls on bf16 shifted taps.
        y = jnp.dot(h_bf, w_ref[pad_l],
                    preferred_element_type=jnp.float32)        # center tap
        for dk in range(K):
            s = pad_l - dk
            if s == 0:
                continue
            y = y + jnp.dot(_shift_rows(h_bf, s), w_ref[dk],
                            preferred_element_type=jnp.float32)
        y = y + b_ref[...]                      # bias (padded lanes stay 0)
        y = jnp.maximum(y, 0.0)                 # ReLU; padded rows re-zeroed below

        # LayerNorm over the real channels.  Padded lanes of y are exactly 0,
        # so the masked variance is recovered with a per-row scalar correction
        # instead of a per-layer iota/select pass.
        inv_cr = 1.0 / cr
        mean = jnp.sum(y, axis=-1, keepdims=True) * inv_cr
        centered = y - mean
        sq = jnp.sum(centered * centered, axis=-1, keepdims=True)
        if cr != cpad:
            sq = sq - float(cpad - cr) * (mean * mean)
        var = sq * inv_cr
        y = centered * jax.lax.rsqrt(var + eps) * g_ref[...] + be_ref[...]
        # gamma/beta padded lanes are 0 -> padded lanes of y stay exactly 0.

        h_f32 = y * keep                        # masked_fill after norm (kept!)
        h_bf = h_f32.astype(jnp.bfloat16)
        # TODO(synk): nn.Dropout is identity in eval mode; training-mode
        # dropout is not modeled.

    # Final Linear(C, 1) as a lane reduction, then -inf fill on padding.
    logd = jnp.sum(h_f32 * fcw_ref[...], axis=-1, keepdims=True) + fcb_ref[...]
    o_ref[...] = jnp.where(keep > 0.5, logd, -jnp.inf)


# --------------------------------------------------------------------------
# Host-side weight packing (lane padding, per-tap weight slabs, bf16)
# --------------------------------------------------------------------------
def pack_params(params, kernel_size):
    K = kernel_size
    blocks = []
    cout_real = []
    cin_real0 = params["blocks"][0][0].shape[1]
    cin_pad = _round_up(cin_real0)              # layer-0 input lanes padded too
    for (w, b, g, beta) in params["blocks"]:
        cout, cin, _ = w.shape
        cout_pad = _round_up(cout)
        wk = jnp.transpose(w, (2, 1, 0))        # (K, Cin, Cout)
        wk = jnp.pad(wk, ((0, 0), (0, cin_pad - cin), (0, cout_pad - cout)))
        cp = (0, cout_pad - cout)
        blocks.append((
            wk.astype(jnp.bfloat16),                                    # (K,Cip,Cop)
            jnp.pad(b, cp).reshape(1, cout_pad).astype(jnp.float32),
            jnp.pad(g, cp).reshape(1, cout_pad).astype(jnp.float32),
            jnp.pad(beta, cp).reshape(1, cout_pad).astype(jnp.float32)))
        cout_real.append(cout)
        cin_pad = cout_pad
    c_last = params["fc_w"].shape[0]
    fcw = jnp.pad(params["fc_w"], (0, cin_pad - c_last))
    fcw = fcw.reshape(1, cin_pad).astype(jnp.float32)
    fcb = params["fc_b"].reshape(1, 1).astype(jnp.float32)
    cin0_pad = _round_up(cin_real0)
    return blocks, fcw, fcb, tuple(cout_real), cin0_pad


# --------------------------------------------------------------------------
# pallas_call wrapper
# --------------------------------------------------------------------------
def fused_forward(x_blc, keep3, packed, *, kernel_size, eps=1e-5):
    blocks, fcw, fcb, cout_real, _ = packed
    B, L, cin0_pad = x_blc.shape
    num_layers = len(blocks)

    inputs = [x_blc, keep3]
    in_specs = [
        pl.BlockSpec((pl.Squeezed(), L, cin0_pad), lambda b: (b, 0, 0)),
        pl.BlockSpec((pl.Squeezed(), L, 1), lambda b: (b, 0, 0)),
    ]
    for arrs in blocks:
        for a in arrs:                                  # weights: VMEM-resident
            inputs.append(a)
            in_specs.append(
                pl.BlockSpec(a.shape, lambda b, _n=a.ndim: (0,) * _n))
    inputs += [fcw, fcb]
    in_specs += [pl.BlockSpec(fcw.shape, lambda b: (0, 0)),
                 pl.BlockSpec(fcb.shape, lambda b: (0, 0))]

    kern = functools.partial(_fused_kernel, num_layers=num_layers,
                             kernel_size=kernel_size, cout_real=cout_real,
                             eps=eps)
    out = pl.pallas_call(
        kern,
        grid=(B,),
        out_shape=jax.ShapeDtypeStruct((B, L, 1), jnp.float32),
        in_specs=in_specs,
        out_specs=pl.BlockSpec((pl.Squeezed(), L, 1), lambda b: (b, 0, 0)),
        compiler_params=pltpu.CompilerParams(
            dimension_semantics=("parallel",),
            vmem_limit_bytes=_pick_vmem_limit()),
    )(*inputs)
    return out[..., 0]                                  # (B, L)


# --------------------------------------------------------------------------
# Module wrapper (parameter plumbing / permutes / padding only)
# --------------------------------------------------------------------------
def fastspeech_duration_predictor(x_in, padding_mask, params, *,
                                  kernel_size=3, batch_first=False,
                                  channels_last=True, stop_gradient=True):
    if not channels_last and not batch_first:
        raise NotImplementedError(
            "batch_first=False and channels_last=False is not supported.")
    if stop_gradient:
        x_in = jax.lax.stop_gradient(x_in)

    if batch_first:
        h = x_in if channels_last else jnp.transpose(x_in, (0, 2, 1))
    else:
        h = jnp.transpose(x_in, (1, 0, 2))              # (L, B, C) -> (B, L, C)

    B, L, cin0 = h.shape
    if padding_mask is None:
        padding_mask = jnp.zeros((B, L), dtype=bool)
    if padding_mask.ndim == 1:
        padding_mask = jnp.broadcast_to(padding_mask[None, :], (B, L))
    keep3 = (1.0 - padding_mask.astype(jnp.float32))[..., None]   # (B, L, 1)

    packed = pack_params(params, kernel_size)
    cin0_pad = packed[4]

    # Ship the input bf16 (it only ever feeds a bf16 MXU matmul) and lane-pad
    # the channel dim with exact zeros so layer 0 is fully 128-lane aligned.
    h = h.astype(jnp.bfloat16)
    if cin0_pad != cin0:
        h = jnp.pad(h, ((0, 0), (0, 0), (0, cin0_pad - cin0)))

    logd = fused_forward(h, keep3, packed, kernel_size=kernel_size)  # (B, L)
    if not batch_first:
        logd = jnp.transpose(logd, (1, 0))              # (L, B)
    return logd


# --------------------------------------------------------------------------
# Deterministic parameter init (synthetic; mirrors module shapes)
# --------------------------------------------------------------------------
def init_params(key, num_features, kernel_size):
    blocks = []
    for i in range(len(num_features) - 1):
        cin, cout = num_features[i], num_features[i + 1]
        key, k1, k2 = jax.random.split(key, 3)
        scale = 1.0 / float(cin * kernel_size) ** 0.5
        w = jax.random.uniform(k1, (cout, cin, kernel_size), jnp.float32,
                               -scale, scale)
        b = jax.random.uniform(k2, (cout,), jnp.float32, -scale, scale)
        g = jnp.ones((cout,), jnp.float32)
        beta = jnp.zeros((cout,), jnp.float32)
        blocks.append((w, b, g, beta))
    c_last = num_features[-1]
    key, k1, k2 = jax.random.split(key, 3)
    sc = 1.0 / float(c_last) ** 0.5
    fc_w = jax.random.uniform(k1, (c_last,), jnp.float32, -sc, sc)
    fc_b = jax.random.uniform(k2, (1,), jnp.float32, -sc, sc)
    return {"blocks": blocks, "fc_w": fc_w, "fc_b": fc_b}


# --------------------------------------------------------------------------
# Pure-JAX reference (mirrors the PyTorch forward exactly) for validation
# --------------------------------------------------------------------------
def ref_forward(x_in, padding_mask, params, *, kernel_size=3, eps=1e-5):
    x = jnp.transpose(x_in, (1, 2, 0))        # (L, B, C) -> (B, C, L)
    mask = padding_mask
    mb = mask[:, None, :]
    K = kernel_size
    pad_l = (K - 1) // 2
    pad_r = K - 1 - pad_l
    for (w, b, g, beta) in params["blocks"]:
        x = jnp.where(mb, 0.0, x)
        xp = jnp.pad(x, ((0, 0), (0, 0), (pad_l, pad_r)))
        y = jax.lax.conv_general_dilated(
            xp, w, window_strides=(1,), padding="VALID",
            dimension_numbers=("NCH", "OIH", "NCH"),
            precision=jax.lax.Precision.HIGHEST)
        y = y + b[None, :, None]
        y = jnp.where(mb, 0.0, y)
        y = jnp.maximum(y, 0.0)
        yt = jnp.transpose(y, (0, 2, 1))
        mean = yt.mean(-1, keepdims=True)
        var = ((yt - mean) ** 2).mean(-1, keepdims=True)
        yt = (yt - mean) / jnp.sqrt(var + eps) * g + beta
        y = jnp.transpose(yt, (0, 2, 1))
        x = jnp.where(mb, 0.0, y)
    xt = jnp.transpose(x, (0, 2, 1))          # (B, L, C)
    logd = jnp.sum(xt * params["fc_w"], axis=-1) + params["fc_b"][0]
    logd = jnp.where(mask, -jnp.inf, logd)
    return jnp.transpose(logd, (1, 0))        # (L, B)


if __name__ == "__main__":
    key = jax.random.PRNGKey(0)
    num_features = [16, 32, 32]
    kernel_size = 3
    L, B = 8, 2

    kx, kp = jax.random.split(key)
    x_in = jax.random.normal(kx, (L, B, num_features[0]), jnp.float32)
    padding_mask = jnp.array(
        [[False] * L,
         [False] * (L - 3) + [True] * 3], dtype=bool)     # (B, L)

    params = init_params(kp, num_features, kernel_size)

    out = fastspeech_duration_predictor(
        x_in, padding_mask, params, kernel_size=kernel_size,
        batch_first=False, channels_last=True, stop_gradient=True)
    out = jax.block_until_ready(out)

    ref = np.asarray(ref_forward(x_in, padding_mask, params,
                                 kernel_size=kernel_size))
    got = np.asarray(out)

    assert got.shape == (L, B), got.shape
    finite_ref = np.isfinite(ref)
    assert np.array_equal(finite_ref, np.isfinite(got)), "padding -inf mismatch"
    np.testing.assert_allclose(got[finite_ref], ref[finite_ref],
                               rtol=2e-2, atol=2e-2)
    print("KERNEL_OK")
</pallas_src>

<mosaic_0001>
module attributes {stable_mosaic.version = 11 : i64} {
  func.func @_fused_kernel(%arg0: i32, %arg1: memref<1x8x128xbf16, #tpu.memory_space<vmem>>, %arg2: memref<1x8x1xf32, #tpu.memory_space<vmem>>, %arg3: memref<3x128x128xbf16, #tpu.memory_space<vmem>>, %arg4: memref<1x128xf32, #tpu.memory_space<vmem>>, %arg5: memref<1x128xf32, #tpu.memory_space<vmem>>, %arg6: memref<1x128xf32, #tpu.memory_space<vmem>>, %arg7: memref<3x128x128xbf16, #tpu.memory_space<vmem>>, %arg8: memref<1x128xf32, #tpu.memory_space<vmem>>, %arg9: memref<1x128xf32, #tpu.memory_space<vmem>>, %arg10: memref<1x128xf32, #tpu.memory_space<vmem>>, %arg11: memref<1x128xf32, #tpu.memory_space<vmem>>, %arg12: memref<1x1xf32, #tpu.memory_space<vmem>>, %arg13: memref<1x8x1xf32, #tpu.memory_space<vmem>>) attributes {dimension_semantics = [#tpu.dimension_semantics<parallel>], iteration_bounds = array<i64: 2>, scalar_prefetch = 0 : i64, scratch_operands = 0 : i64, tpu.core_type = #tpu.core_type<tc>, window_params = [{transform_indices = @transform_0, window_bounds = array<i64: 1, 8, 128>}, {transform_indices = @transform_1, window_bounds = array<i64: 1, 8, 1>}, {pipeline_mode = #tpu.pipeline_mode<synchronous>, transform_indices = @transform_2, window_bounds = array<i64: 3, 128, 128>}, {pipeline_mode = #tpu.pipeline_mode<synchronous>, transform_indices = @transform_3, window_bounds = array<i64: 1, 128>}, {pipeline_mode = #tpu.pipeline_mode<synchronous>, transform_indices = @transform_4, window_bounds = array<i64: 1, 128>}, {pipeline_mode = #tpu.pipeline_mode<synchronous>, transform_indices = @transform_5, window_bounds = array<i64: 1, 128>}, {pipeline_mode = #tpu.pipeline_mode<synchronous>, transform_indices = @transform_6, window_bounds = array<i64: 3, 128, 128>}, {pipeline_mode = #tpu.pipeline_mode<synchronous>, transform_indices = @transform_7, window_bounds = array<i64: 1, 128>}, {pipeline_mode = #tpu.pipeline_mode<synchronous>, transform_indices = @transform_8, window_bounds = array<i64: 1, 128>}, {pipeline_mode = #tpu.pipeline_mode<synchronous>, transform_indices = @transform_9, window_bounds = array<i64: 1, 128>}, {pipeline_mode = #tpu.pipeline_mode<synchronous>, transform_indices = @transform_10, window_bounds = array<i64: 1, 128>}, {pipeline_mode = #tpu.pipeline_mode<synchronous>, transform_indices = @transform_11, window_bounds = array<i64: 1, 1>}, {transform_indices = @transform_12, window_bounds = array<i64: 1, 8, 1>}]} {
    %c0 = arith.constant 0 : index
    %c0_0 = arith.constant 0 : index
    %c0_1 = arith.constant 0 : index
    %0 = vector.load %arg2[%c0, %c0_0, %c0_1] : memref<1x8x1xf32, #tpu.memory_space<vmem>>, vector<1x8x1xf32>
    %1 = vector.shape_cast %0 : vector<1x8x1xf32> to vector<8x1xf32>
    %2 = arith.truncf %1 : vector<8x1xf32> to vector<8x1xbf16>
    %c0_2 = arith.constant 0 : index
    %c0_3 = arith.constant 0 : index
    %c0_4 = arith.constant 0 : index
    %3 = vector.load %arg1[%c0_2, %c0_3, %c0_4] : memref<1x8x128xbf16, #tpu.memory_space<vmem>>, vector<1x8x128xbf16>
    %4 = vector.shape_cast %3 : vector<1x8x128xbf16> to vector<8x128xbf16>
    %5 = vector.broadcast %2 : vector<8x1xbf16> to vector<8x128xbf16>
    %6 = arith.mulf %4, %5 : vector<8x128xbf16>
    %c1 = arith.constant 1 : index
    %c0_5 = arith.constant 0 : index
    %c0_6 = arith.constant 0 : index
    %7 = vector.load %arg3[%c1, %c0_5, %c0_6] : memref<3x128x128xbf16, #tpu.memory_space<vmem>>, vector<1x128x128xbf16>
    %8 = vector.shape_cast %7 : vector<1x128x128xbf16> to vector<128x128xbf16>
    %cst = arith.constant dense<0.000000e+00> : vector<8x128xf32>
    %9 = tpu.matmul %6, %8, %cst {dimension_numbers = #tpu.dot_dimension_numbers<[1], [0], [0], [1], [0, 0, 1, 1], [], []>} : vector<8x128xbf16>, vector<128x128xbf16>, vector<8x128xf32> -> vector<8x128xf32>
    %cst_7 = arith.constant 0.000000e+00 : bf16
    %10 = vector.broadcast %cst_7 : bf16 to vector<1x128xbf16>
    %11 = vector.extract_strided_slice %6 {offsets = [0, 0], sizes = [7, 128], strides = [1, 1]} : vector<8x128xbf16> to vector<7x128xbf16>
    %12 = tpu.concatenate %10, %11 in 0 : vector<1x128xbf16>, vector<7x128xbf16> -> vector<8x128xbf16>
    %c0_8 = arith.constant 0 : index
    %c0_9 = arith.constant 0 : index
    %c0_10 = arith.constant 0 : index
    %13 = vector.load %arg3[%c0_8, %c0_9, %c0_10] : memref<3x128x128xbf16, #tpu.memory_space<vmem>>, vector<1x128x128xbf16>
    %14 = vector.shape_cast %13 : vector<1x128x128xbf16> to vector<128x128xbf16>
    %cst_11 = arith.constant dense<0.000000e+00> : vector<8x128xf32>
    %15 = tpu.matmul %12, %14, %cst_11 {dimension_numbers = #tpu.dot_dimension_numbers<[1], [0], [0], [1], [0, 0, 1, 1], [], []>} : vector<8x128xbf16>, vector<128x128xbf16>, vector<8x128xf32> -> vector<8x128xf32>
    %16 = arith.addf %9, %15 : vector<8x128xf32>
    %cst_12 = arith.constant 0.000000e+00 : bf16
    %17 = vector.broadcast %cst_12 : bf16 to vector<1x128xbf16>
    %18 = vector.extract_strided_slice %6 {offsets = [1, 0], sizes = [7, 128], strides = [1, 1]} : vector<8x128xbf16> to vector<7x128xbf16>
    %19 = tpu.concatenate %18, %17 in 0 : vector<7x128xbf16>, vector<1x128xbf16> -> vector<8x128xbf16>
    %c2 = arith.constant 2 : index
    %c0_13 = arith.constant 0 : index
    %c0_14 = arith.constant 0 : index
    %20 = vector.load %arg3[%c2, %c0_13, %c0_14] : memref<3x128x128xbf16, #tpu.memory_space<vmem>>, vector<1x128x128xbf16>
    %21 = vector.shape_cast %20 : vector<1x128x128xbf16> to vector<128x128xbf16>
    %cst_15 = arith.constant dense<0.000000e+00> : vector<8x128xf32>
    %22 = tpu.matmul %19, %21, %cst_15 {dimension_numbers = #tpu.dot_dimension_numbers<[1], [0], [0], [1], [0, 0, 1, 1], [], []>} : vector<8x128xbf16>, vector<128x128xbf16>, vector<8x128xf32> -> vector<8x128xf32>
    %23 = arith.addf %16, %22 : vector<8x128xf32>
    %c0_16 = arith.constant 0 : index
    %c0_17 = arith.constant 0 : index
    %24 = vector.load %arg4[%c0_16, %c0_17] : memref<1x128xf32, #tpu.memory_space<vmem>>, vector<1x128xf32>
    %25 = vector.broadcast %24 : vector<1x128xf32> to vector<8x128xf32>
    %26 = arith.addf %23, %25 : vector<8x128xf32>
    %cst_18 = arith.constant 0.000000e+00 : f32
    %27 = vector.broadcast %cst_18 : f32 to vector<8x128xf32>
    %28 = arith.maximumf %26, %27 : vector<8x128xf32>
    %cst_19 = arith.constant dense<0.000000e+00> : vector<8xf32>
    %29 = vector.multi_reduction <add>, %28, %cst_19 [1] : vector<8x128xf32> to vector<8xf32>
    %30 = vector.shape_cast %29 : vector<8xf32> to vector<8x1xf32>
    %cst_20 = arith.constant 3.125000e-02 : f32
    %31 = vector.broadcast %cst_20 : f32 to vector<8x1xf32>
    %32 = arith.mulf %30, %31 : vector<8x1xf32>
    %33 = vector.broadcast %32 : vector<8x1xf32> to vector<8x128xf32>
    %34 = arith.subf %28, %33 : vector<8x128xf32>
    %35 = arith.mulf %34, %34 : vector<8x128xf32>
    %cst_21 = arith.constant dense<0.000000e+00> : vector<8xf32>
    %36 = vector.multi_reduction <add>, %35, %cst_21 [1] : vector<8x128xf32> to vector<8xf32>
    %37 = vector.shape_cast %36 : vector<8xf32> to vector<8x1xf32>
    %38 = arith.mulf %32, %32 : vector<8x1xf32>
    %cst_22 = arith.constant 9.600000e+01 : f32
    %39 = vector.broadcast %cst_22 : f32 to vector<8x1xf32>
    %40 = arith.mulf %39, %38 : vector<8x1xf32>
    %41 = arith.subf %37, %40 : vector<8x1xf32>
    %cst_23 = arith.constant 3.125000e-02 : f32
    %42 = vector.broadcast %cst_23 : f32 to vector<8x1xf32>
    %43 = arith.mulf %41, %42 : vector<8x1xf32>
    %cst_24 = arith.constant 9.99999974E-6 : f32
    %44 = vector.broadcast %cst_24 : f32 to vector<8x1xf32>
    %45 = arith.addf %43, %44 : vector<8x1xf32>
    %46 = math.rsqrt %45 : vector<8x1xf32>
    %47 = vector.broadcast %46 : vector<8x1xf32> to vector<8x128xf32>
    %48 = arith.mulf %34, %47 : vector<8x128xf32>
    %c0_25 = arith.constant 0 : index
    %c0_26 = arith.constant 0 : index
    %49 = vector.load %arg5[%c0_25, %c0_26] : memref<1x128xf32, #tpu.memory_space<vmem>>, vector<1x128xf32>
    %50 = vector.broadcast %49 : vector<1x128xf32> to vector<8x128xf32>
    %51 = arith.mulf %48, %50 : vector<8x128xf32>
    %c0_27 = arith.constant 0 : index
    %c0_28 = arith.constant 0 : index
    %52 = vector.load %arg6[%c0_27, %c0_28] : memref<1x128xf32, #tpu.memory_space<vmem>>, vector<1x128xf32>
    %53 = vector.broadcast %52 : vector<1x128xf32> to vector<8x128xf32>
    %54 = arith.addf %51, %53 : vector<8x128xf32>
    %55 = vector.broadcast %1 : vector<8x1xf32> to vector<8x128xf32>
    %56 = arith.mulf %54, %55 : vector<8x128xf32>
    %57 = arith.truncf %56 : vector<8x128xf32> to vector<8x128xbf16>
    %c1_29 = arith.constant 1 : index
    %c0_30 = arith.constant 0 : index
    %c0_31 = arith.constant 0 : index
    %58 = vector.load %arg7[%c1_29, %c0_30, %c0_31] : memref<3x128x128xbf16, #tpu.memory_space<vmem>>, vector<1x128x128xbf16>
    %59 = vector.shape_cast %58 : vector<1x128x128xbf16> to vector<128x128xbf16>
    %cst_32 = arith.constant dense<0.000000e+00> : vector<8x128xf32>
    %60 = tpu.matmul %57, %59, %cst_32 {dimension_numbers = #tpu.dot_dimension_numbers<[1], [0], [0], [1], [0, 0, 1, 1], [], []>} : vector<8x128xbf16>, vector<128x128xbf16>, vector<8x128xf32> -> vector<8x128xf32>
    %cst_33 = arith.constant 0.000000e+00 : bf16
    %61 = vector.broadcast %cst_33 : bf16 to vector<1x128xbf16>
    %62 = vector.extract_strided_slice %57 {offsets = [0, 0], sizes = [7, 128], strides = [1, 1]} : vector<8x128xbf16> to vector<7x128xbf16>
    %63 = tpu.concatenate %61, %62 in 0 : vector<1x128xbf16>, vector<7x128xbf16> -> vector<8x128xbf16>
    %c0_34 = arith.constant 0 : index
    %c0_35 = arith.constant 0 : index
    %c0_36 = arith.constant 0 : index
    %64 = vector.load %arg7[%c0_34, %c0_35, %c0_36] : memref<3x128x128xbf16, #tpu.memory_space<vmem>>, vector<1x128x128xbf16>
    %65 = vector.shape_cast %64 : vector<1x128x128xbf16> to vector<128x128xbf16>
    %cst_37 = arith.constant dense<0.000000e+00> : vector<8x128xf32>
    %66 = tpu.matmul %63, %65, %cst_37 {dimension_numbers = #tpu.dot_dimension_numbers<[1], [0], [0], [1], [0, 0, 1, 1], [], []>} : vector<8x128xbf16>, vector<128x128xbf16>, vector<8x128xf32> -> vector<8x128xf32>
    %67 = arith.addf %60, %66 : vector<8x128xf32>
    %cst_38 = arith.constant 0.000000e+00 : bf16
    %68 = vector.broadcast %cst_38 : bf16 to vector<1x128xbf16>
    %69 = vector.extract_strided_slice %57 {offsets = [1, 0], sizes = [7, 128], strides = [1, 1]} : vector<8x128xbf16> to vector<7x128xbf16>
    %70 = tpu.concatenate %69, %68 in 0 : vector<7x128xbf16>, vector<1x128xbf16> -> vector<8x128xbf16>
    %c2_39 = arith.constant 2 : index
    %c0_40 = arith.constant 0 : index
    %c0_41 = arith.constant 0 : index
    %71 = vector.load %arg7[%c2_39, %c0_40, %c0_41] : memref<3x128x128xbf16, #tpu.memory_space<vmem>>, vector<1x128x128xbf16>
    %72 = vector.shape_cast %71 : vector<1x128x128xbf16> to vector<128x128xbf16>
    %cst_42 = arith.constant dense<0.000000e+00> : vector<8x128xf32>
    %73 = tpu.matmul %70, %72, %cst_42 {dimension_numbers = #tpu.dot_dimension_numbers<[1], [0], [0], [1], [0, 0, 1, 1], [], []>} : vector<8x128xbf16>, vector<128x128xbf16>, vector<8x128xf32> -> vector<8x128xf32>
    %74 = arith.addf %67, %73 : vector<8x128xf32>
    %c0_43 = arith.constant 0 : index
    %c0_44 = arith.constant 0 : index
    %75 = vector.load %arg8[%c0_43, %c0_44] : memref<1x128xf32, #tpu.memory_space<vmem>>, vector<1x128xf32>
    %76 = vector.broadcast %75 : vector<1x128xf32> to vector<8x128xf32>
    %77 = arith.addf %74, %76 : vector<8x128xf32>
    %cst_45 = arith.constant 0.000000e+00 : f32
    %78 = vector.broadcast %cst_45 : f32 to vector<8x128xf32>
    %79 = arith.maximumf %77, %78 : vector<8x128xf32>
    %cst_46 = arith.constant dense<0.000000e+00> : vector<8xf32>
    %80 = vector.multi_reduction <add>, %79, %cst_46 [1] : vector<8x128xf32> to vector<8xf32>
    %81 = vector.shape_cast %80 : vector<8xf32> to vector<8x1xf32>
    %cst_47 = arith.constant 3.125000e-02 : f32
    %82 = vector.broadcast %cst_47 : f32 to vector<8x1xf32>
    %83 = arith.mulf %81, %82 : vector<8x1xf32>
    %84 = vector.broadcast %83 : vector<8x1xf32> to vector<8x128xf32>
    %85 = arith.subf %79, %84 : vector<8x128xf32>
    %86 = arith.mulf %85, %85 : vector<8x128xf32>
    %cst_48 = arith.constant dense<0.000000e+00> : vector<8xf32>
    %87 = vector.multi_reduction <add>, %86, %cst_48 [1] : vector<8x128xf32> to vector<8xf32>
    %88 = vector.shape_cast %87 : vector<8xf32> to vector<8x1xf32>
    %89 = arith.mulf %83, %83 : vector<8x1xf32>
    %cst_49 = arith.constant 9.600000e+01 : f32
    %90 = vector.broadcast %cst_49 : f32 to vector<8x1xf32>
    %91 = arith.mulf %90, %89 : vector<8x1xf32>
    %92 = arith.subf %88, %91 : vector<8x1xf32>
    %cst_50 = arith.constant 3.125000e-02 : f32
    %93 = vector.broadcast %cst_50 : f32 to vector<8x1xf32>
    %94 = arith.mulf %92, %93 : vector<8x1xf32>
    %cst_51 = arith.constant 9.99999974E-6 : f32
    %95 = vector.broadcast %cst_51 : f32 to vector<8x1xf32>
    %96 = arith.addf %94, %95 : vector<8x1xf32>
    %97 = math.rsqrt %96 : vector<8x1xf32>
    %98 = vector.broadcast %97 : vector<8x1xf32> to vector<8x128xf32>
    %99 = arith.mulf %85, %98 : vector<8x128xf32>
    %c0_52 = arith.constant 0 : index
    %c0_53 = arith.constant 0 : index
    %100 = vector.load %arg9[%c0_52, %c0_53] : memref<1x128xf32, #tpu.memory_space<vmem>>, vector<1x128xf32>
    %101 = vector.broadcast %100 : vector<1x128xf32> to vector<8x128xf32>
    %102 = arith.mulf %99, %101 : vector<8x128xf32>
    %c0_54 = arith.constant 0 : index
    %c0_55 = arith.constant 0 : index
    %103 = vector.load %arg10[%c0_54, %c0_55] : memref<1x128xf32, #tpu.memory_space<vmem>>, vector<1x128xf32>
    %104 = vector.broadcast %103 : vector<1x128xf32> to vector<8x128xf32>
    %105 = arith.addf %102, %104 : vector<8x128xf32>
    %106 = vector.broadcast %1 : vector<8x1xf32> to vector<8x128xf32>
    %107 = arith.mulf %105, %106 : vector<8x128xf32>
    %c0_56 = arith.constant 0 : index
    %c0_57 = arith.constant 0 : index
    %108 = vector.load %arg11[%c0_56, %c0_57] : memref<1x128xf32, #tpu.memory_space<vmem>>, vector<1x128xf32>
    %109 = vector.broadcast %108 : vector<1x128xf32> to vector<8x128xf32>
    %110 = arith.mulf %107, %109 : vector<8x128xf32>
    %cst_58 = arith.constant dense<0.000000e+00> : vector<8xf32>
    %111 = vector.multi_reduction <add>, %110, %cst_58 [1] : vector<8x128xf32> to vector<8xf32>
    %112 = vector.shape_cast %111 : vector<8xf32> to vector<8x1xf32>
    %c0_59 = arith.constant 0 : index
    %c0_60 = arith.constant 0 : index
    %113 = vector.load %arg12[%c0_59, %c0_60] : memref<1x1xf32, #tpu.memory_space<vmem>>, vector<1x1xf32>
    %114 = vector.broadcast %113 : vector<1x1xf32> to vector<8x1xf32>
    %115 = arith.addf %112, %114 : vector<8x1xf32>
    %cst_61 = arith.constant 5.000000e-01 : f32
    %116 = vector.broadcast %cst_61 : f32 to vector<8x1xf32>
    %117 = arith.cmpf ogt, %1, %116 : vector<8x1xf32>
    %cst_62 = arith.constant 0xFF800000 : f32
    %118 = vector.broadcast %cst_62 : f32 to vector<8x1xf32>
    %119 = arith.select %117, %115, %118 : vector<8x1xi1>, vector<8x1xf32>
    %c0_63 = arith.constant 0 : index
    %c0_64 = arith.constant 0 : index
    %c0_65 = arith.constant 0 : index
    %120 = vector.load %arg13[%c0_63, %c0_64, %c0_65] : memref<1x8x1xf32, #tpu.memory_space<vmem>>, vector<1x8x1xf32>
    %121 = vector.shape_cast %120 : vector<1x8x1xf32> to vector<8x1xf32>
    %122 = vector.shape_cast %119 : vector<8x1xf32> to vector<1x8x1xf32>
    tpu.vector_store %arg13[%c0_63, %c0_64, %c0_65], %122 {strides = array<i32>} : memref<1x8x1xf32, #tpu.memory_space<vmem>>, vector<1x8x1xf32>,
    return
  }
  func.func @transform_0(%arg0: i32) -> (i32, i32, i32) {
    %c0_i32 = arith.constant 0 : i32
    %c0_i32_0 = arith.constant 0 : i32
    %c0_i32_1 = arith.constant 0 : i32
    return %arg0, %c0_i32, %c0_i32_0 : i32, i32, i32
  }
  func.func @transform_1(%arg0: i32) -> (i32, i32, i32) {
    %c0_i32 = arith.constant 0 : i32
    %c0_i32_0 = arith.constant 0 : i32
    %c0_i32_1 = arith.constant 0 : i32
    return %arg0, %c0_i32, %c0_i32_0 : i32, i32, i32
  }
  func.func @transform_2(%arg0: i32) -> (i32, i32, i32) {
    %c0_i32 = arith.constant 0 : i32
    %c0_i32_0 = arith.constant 0 : i32
    %c0_i32_1 = arith.constant 0 : i32
    %c0_i32_2 = arith.constant 0 : i32
    return %c0_i32, %c0_i32_0, %c0_i32_1 : i32, i32, i32
  }
  func.func @transform_3(%arg0: i32) -> (i32, i32) {
    %c0_i32 = arith.constant 0 : i32
    %c0_i32_0 = arith.constant 0 : i32
    %c0_i32_1 = arith.constant 0 : i32
    return %c0_i32, %c0_i32_0 : i32, i32
  }
  func.func @transform_4(%arg0: i32) -> (i32, i32) {
    %c0_i32 = arith.constant 0 : i32
    %c0_i32_0 = arith.constant 0 : i32
    %c0_i32_1 = arith.constant 0 : i32
    return %c0_i32, %c0_i32_0 : i32, i32
  }
  func.func @transform_5(%arg0: i32) -> (i32, i32) {
    %c0_i32 = arith.constant 0 : i32
    %c0_i32_0 = arith.constant 0 : i32
    %c0_i32_1 = arith.constant 0 : i32
    return %c0_i32, %c0_i32_0 : i32, i32
  }
  func.func @transform_6(%arg0: i32) -> (i32, i32, i32) {
    %c0_i32 = arith.constant 0 : i32
    %c0_i32_0 = arith.constant 0 : i32
    %c0_i32_1 = arith.constant 0 : i32
    %c0_i32_2 = arith.constant 0 : i32
    return %c0_i32, %c0_i32_0, %c0_i32_1 : i32, i32, i32
  }
  func.func @transform_7(%arg0: i32) -> (i32, i32) {
    %c0_i32 = arith.constant 0 : i32
    %c0_i32_0 = arith.constant 0 : i32
    %c0_i32_1 = arith.constant 0 : i32
    return %c0_i32, %c0_i32_0 : i32, i32
  }
  func.func @transform_8(%arg0: i32) -> (i32, i32) {
    %c0_i32 = arith.constant 0 : i32
    %c0_i32_0 = arith.constant 0 : i32
    %c0_i32_1 = arith.constant 0 : i32
    return %c0_i32, %c0_i32_0 : i32, i32
  }
  func.func @transform_9(%arg0: i32) -> (i32, i32) {
    %c0_i32 = arith.constant 0 : i32
    %c0_i32_0 = arith.constant 0 : i32
    %c0_i32_1 = arith.constant 0 : i32
    return %c0_i32, %c0_i32_0 : i32, i32
  }
  func.func @transform_10(%arg0: i32) -> (i32, i32) {
    %c0_i32 = arith.constant 0 : i32
    %c0_i32_0 = arith.constant 0 : i32
    %c0_i32_1 = arith.constant 0 : i32
    return %c0_i32, %c0_i32_0 : i32, i32
  }
  func.func @transform_11(%arg0: i32) -> (i32, i32) {
    %c0_i32 = arith.constant 0 : i32
    %c0_i32_0 = arith.constant 0 : i32
    %c0_i32_1 = arith.constant 0 : i32
    return %c0_i32, %c0_i32_0 : i32, i32
  }
  func.func @transform_12(%arg0: i32) -> (i32, i32, i32) {
    %c0_i32 = arith.constant 0 : i32
    %c0_i32_0 = arith.constant 0 : i32
    %c0_i32_1 = arith.constant 0 : i32
    return %arg0, %c0_i32, %c0_i32_0 : i32, i32, i32
  }
}

</mosaic_0001>

<bundles_post_ra>
// kernel: tpu_custom_call.1
= control target key start
LH: loop header
LB: loop body
LE: loop exit
PB: predicated region body
PF: predicated region fallthrough
CT: control target
= control target key end

     0   :  { %s2019_s0 = inlined_call_operand.vmem [shape: bf16[2,8,128], index: 0, kind: input, shape index: {}]   ;;  %s2020_s1 = inlined_call_operand.vmem [shape: f32[2,8,1], index: 1, kind: input, shape index: {}]   ;;  %s2021_s2 = inlined_call_operand.hbm [shape: bf16[3,128,128], index: 2, kind: input, shape index: {}]   ;;  %s2022_s3 = inlined_call_operand.vmem [shape: f32[1,128], index: 3, kind: input, shape index: {}]   ;;  %s2023_s4 = inlined_call_operand.vmem [shape: f32[1,128], index: 4, kind: input, shape index: {}]   ;;  %s2024_s5 = inlined_call_operand.vmem [shape: f32[1,128], index: 5, kind: input, shape index: {}]   ;;  %s2025_s6 = inlined_call_operand.hbm [shape: bf16[3,128,128], index: 6, kind: input, shape index: {}]   ;;  %s2026_s7 = inlined_call_operand.vmem [shape: f32[1,128], index: 7, kind: input, shape index: {}]   ;;  %s2027_s8 = inlined_call_operand.vmem [shape: f32[1,128], index: 8, kind: input, shape index: {}]   ;;  %s2028_s9 = inlined_call_operand.vmem [shape: f32[1,128], index: 9, kind: input, shape index: {}]   ;;  %s2029_s10 = inlined_call_operand.vmem [shape: f32[1,128], index: 10, kind: input, shape index: {}]   ;;  %s2030_s11 = inlined_call_operand.<no memory space> [shape: f32[1,1], index: 11, kind: input, shape index: {}]   ;;  %s2031_s12 = inlined_call_operand.vmem [shape: f32[2,8,1], index: 12, kind: output, shape index: {}]  }
   0x1   :  { %v17_v0 = vstv %s2030_s11 }
   0x2   :  { %18 = vst [vmem:[#allocation2] sm:$0x1] %v17_v0 }
   0x3   :  { %19 = vsyncpa [#allocation4], 0 }
   0x4   :  { %20 = vsyncpa [#allocation6], 0  ;;  %s1808_s23 = smov 0  }
   0x5 LB: > { %s1814_s24 = sadd.s32 4294967295, %s1731_s23   ;;  %p1330_p0 = scmp.ge.s32.totalorder %s1731_s23, 1  ;;  %s1731_s23 = sphi %s1808_s23, %s26_s23  }
   0x6   : > { %p319_p1 = scmp.lt.s32.totalorder %s1731_s23, 3  ;;  %s1733_s11 = smov [#allocation3]  }
   0x7   : > { %s331_s25 = sshll.u32 %s1733_s11, 4  ;;  %p2032_p3 = scmp.eq.s32.totalorder %s1814_s24, 0  ;;  %s332_s25 = int_to_ptr.vmem [resolvable:$true] %s331_s25 }
   0x8   : > { %p1818_p2 = pnand %p1330_p0, %p319_p1  ;;  %s1734_s27 = smov [#allocation5]  }
   0x9   : > { %s353_s28 = sshll.u32 %s1734_s27, 4  ;;  %s1661_s14 = scalar_lea.hbm %s2021_s2, 3072  ;;  %s1831_s28 = int_to_ptr.vmem [resolvable:$true] %s353_s28 }
   0xa   : > { %s2034_s26 = scalar_select %p1818_p2, 1, 0 }
   0xb   : > { %p1581_p4 = pneg %p1818_p2  ;;  %p1662_p6 = scmp.ne.s32.totalorder %s2021_s2, %s1661_s14 }
   0xc   : > { %p1668_p10 = scmp.lt.u32.totalorder %s1661_s14, %s2021_s2 }
   0xd   : > { %p1827_p5 = pnand %p2032_p3, %p1581_p4 }
   0xf   : > { %p1663_p7 = pneg %p1827_p5 }
  0x11   : > { %p1664_p8 = pnand %p1663_p7, %p1662_p6 }
  0x13   : > { %p1665_p9 = pneg %p1664_p8 }
  0x15   : > { %p1670_p11 = pnand %p1668_p10, %p1665_p9 }
  0x17   : > { %1673 = shalt.err (!%p1670_p11)
}
  0x18   : > { %s1674_s19 = scalar_lea.vmem %s332_s25, 3072  ;;  %p1682_p1 = scmp.lt.s32.totalorder %s332_s25, %s332_s25 }
  0x19   : > { %p1675_p12 = scmp.ne.s32.totalorder %s332_s25, %s1674_s19  ;;  %p1683_p4 = scmp.lt.s32.totalorder %s1674_s19, %s1674_s19 }
  0x1b   : > { %p1677_p13 = pnand %p1675_p12, %p1663_p7  ;;  %p1684_p3 = por %p1683_p4, %p1682_p1 }
  0x1d   : > { %p1678_p0 = pneg %p1677_p13 }
  0x1f   : > { %p1685_p2 = pnand %p1684_p3, %p1678_p0 }
  0x21   : > { %1688 = shalt.err (!%p1685_p2)
}
  0x22   : > { %s1735_s20 = smov 64   ;;  %s1736_s21 = smov 4  }
  0x23   : > { %1584 = dma.hbm_to_vmem [thread:$0]  (!%p1827_p5), %s2021_s2, 3072, %s332_s25, [#allocation4], %s1735_s20, %s1735_s20, %s1736_s21  }
  0x24   : > { %s1689_s13 = scalar_lea.hbm %s2025_s6, 3072 }
  0x25   : > { %p1690_p6 = scmp.ne.s32.totalorder %s2025_s6, %s1689_s13  ;;  %p1696_p8 = scmp.lt.u32.totalorder %s1689_s13, %s2025_s6 }
  0x27   : > { %p1692_p2 = pnand %p1690_p6, %p1663_p7 }
  0x29   : > { %p1693_p3 = pneg %p1692_p2 }
  0x2b   : > { %p1698_p9 = pnand %p1696_p8, %p1693_p3 }
  0x2d   : > { %1701 = shalt.err (!%p1698_p9)
}
  0x2e   : > { %s1702_s25 = scalar_lea.vmem %s1831_s28, 3072  ;;  %p1710_p13 = scmp.lt.s32.totalorder %s1831_s28, %s1831_s28 }
  0x2f   : > { %p1703_p10 = scmp.ne.s32.totalorder %s1831_s28, %s1702_s25  ;;  %p1711_p0 = scmp.lt.s32.totalorder %s1702_s25, %s1702_s25 }
  0x31   : > { %p1705_p11 = pnand %p1703_p10, %p1663_p7  ;;  %p1712_p1 = por %p1711_p0, %p1710_p13 }
  0x33   : > { %p1706_p12 = pneg %p1705_p11 }
  0x35   : > { %p1713_p4 = pnand %p1712_p1, %p1706_p12 }
  0x37   : > { %1716 = shalt.err (!%p1713_p4)
}
  0x38   : > { %1587 = dma.hbm_to_vmem [thread:$0]  (!%p1827_p5), %s2025_s6, 3072, %s1831_s28, [#allocation6], %s1735_s20, %s1735_s20, %s1736_s21  }
  0x39   : > { %p2036_p6 = scmp.ne.s32.totalorder %s2034_s26, 0 }
  0x3a   : > { %p2037_p2 = scmp.eq.s32.totalorder (!%p2036_p6), %s1814_s24, 0 }
  0x3b   : > { %398 = sbr.rel (%p2036_p6) target bundleno = 1504 (0x5e0), region = 68 }
  0x42   : > { %1722 = dma.done.wait (%p2037_p2), [#allocation4], 3072   ;;  %p2038_p7 = pmov %p2037_p2 }
  0x43   : > { %p2039_p3 = pmov %p2037_p2 }
  0x44   : > { %1724 = vsyncadd (%p2038_p7), [#allocation4], 4294964224 }
  0x45   : > { %1726 = dma.done.wait (%p2039_p3), [#allocation6], 3072   ;;  %p2040_p8 = pmov %p2037_p2 }
  0x46   : > { %p446_p9 = scmp.lt.s32.totalorder %s1814_s24, 1  ;;  %v1737_v1 = vmov 0   ;;  %v1738_v2 = vmov 0.0   ;;  %v1609_v5 = vld [vmem:[#allocation3 + $0x40] sm:$0xff]   ;;  %v1610_v6 = vld [vmem:[#allocation3 + $0x48] sm:$0xff]   ;;  %vm1739_vm0 = vmmov 0  }
  0x47   : > { %1728 = vsyncadd (%p2040_p8), [#allocation6], 4294964224  ;;  %1607 = vset.pattern.permute.xlu0 %v1737_v1  ;;  %1473 = vmatprep.subr.bf16.mxu1 %v1738_v2  ;;  %v1611_v7 = vld [vmem:[#allocation3] sm:$0xff]   ;;  %v1613_v8 = vld [vmem:[#allocation3 + $0x8] sm:$0xff]   ;;  %vm496_vm1 = vcmask 1040384   ;;  %vm695_vm4 = vcmask 1043456  }
  0x48   : > { %s2046_s24 = smov (!%p446_p9, %s1814_s24), 1  ;;  %1453 = vmatprep.subr.bf16.mxu0 %v1738_v2  ;;  %1608 = vset.pattern.permute.xlu1 %v1737_v1  ;;  %v1612_v9 = vld [vmem:[#allocation3 + $0x50] sm:$0xff]   ;;  %v1614_v11 = vld [vmem:[#allocation3 + $0x58] sm:$0xff]   ;;  %v1616_v13 = vld [vmem:[#allocation3 + $0x60] sm:$0xff]   ;;  %vm497_vm2 = vsmask.f32 256 }
  0x49   : > { %s1338_s26 = sshll.u32 %s2046_s24, 3  ;;  %1474 = vmatpush3.bf16.msra.mxu1 %v1609_v5  ;;  %1489 = vmatprep.mubr.msk.bf16.mxu1 %vm1739_vm0, %v1738_v2  ;;  %v1615_v10 = vld [vmem:[#allocation3 + $0x10] sm:$0xff]   ;;  %v1617_v12 = vld [vmem:[#allocation3 + $0x18] sm:$0xff]   ;;  %v1619_v14 = vld [vmem:[#allocation3 + $0x20] sm:$0xff]   ;;  %s1337_s21 = sshll.u32 %s2046_s24, 2  ;;  %vm1239_vm8 = vcmask 7168  }
  0x4a   : > { %s453_s20 = scalar_lea.vmem %s2020_s1, %s1338_s26  ;;  %1475 = vmatprep.subr.bf16.mxu1 %v1738_v2  ;;  %1454 = vmatpush3.bf16.msra.mxu0 %v1611_v7  ;;  %v1618_v15 = vld [vmem:[#allocation3 + $0x68] sm:$0xff]   ;;  %v1620_v17 = vld [vmem:[#allocation3 + $0x70] sm:$0xff]   ;;  %v1622_v19 = vld [vmem:[#allocation3 + $0x78] sm:$0xff]   ;;  %s449_s27 = scalar_lea.vmem %s2019_s0, %s1337_s21  ;;  %vm696_vm5 = vsmask.f32 3328 }
  0x4b   : > { %v1902_v3 = vld [vmem:[%s453_s20] sm:$0xff]  ;;  %1469 = vmatprep.mubr.msk.bf16.mxu0 %vm1739_vm0, %v1738_v2  ;;  %1455 = vmatprep.subr.bf16.mxu0 %v1738_v2  ;;  %v1621_v16 = vld [vmem:[#allocation3 + $0x28] sm:$0xff]   ;;  %v1623_v18 = vld [vmem:[#allocation3 + $0x30] sm:$0xff]   ;;  %s457_s30 = scalar_lea.vmem %s2031_s12, %s1338_s26 }
  0x4c   : > { %v460_v4 = vpack.c.bf16 %v1902_v3, %v1902_v3  ;;  %v1624_v20 = vld [vmem:[#allocation3 + $0x38] sm:$0xff]   ;;  %vm1932_vm3 = vmand %vm496_vm1, %vm497_vm2  ;;  %v1625_v30 = vld [vmem:[#allocation3 + $0x80] sm:$0xff]   ;;  %vm1237_vm7 = vcmp.gt.f32.partialorder %v1902_v3, 0.5 }
  0x4d   : > { %1476 = vmatpush3.bf16.msra.mxu1 %v1610_v6  ;;  %v461_v21 = vld [vmem:[%s449_s27] sm:$0xf]  ;;  %v1626_v32 = vld [vmem:[#allocation3 + $0x88] sm:$0xff]   ;;  %v1627_v33 = vld [vmem:[#allocation3 + $0x90] sm:$0xff]  }
  0x4e   : > { %464 = vperm.xlu0 %1607, %v460_v4   ;;  %1477 = vmatprep.subr.bf16.mxu1 %v1738_v2  ;;  %v1628_v34 = vld [vmem:[#allocation3 + $0x98] sm:$0xff]   ;;  %v1629_v35 = vld [vmem:[#allocation3 + $0xa0] sm:$0xff]   ;;  %v1630_v36 = vld [vmem:[#allocation3 + $0xa8] sm:$0xff]  }
  0x4f   : > { %1456 = vmatpush3.bf16.msra.mxu0 %v1613_v8  ;;  %v1631_v37 = vld [vmem:[#allocation3 + $0xb0] sm:$0xff]   ;;  %v1632_v39 = vld [vmem:[#allocation3 + $0xb8] sm:$0xff]   ;;  %vm1947_vm6 = vmand %vm695_vm4, %vm696_vm5 }
  0x50   : > { %1457 = vmatprep.subr.bf16.mxu0 %v1738_v2  ;;  %v1365_v53 = vld [vmem:[%s2022_s3] ss:$0 sm:$0xff]  ;;  %v1633_v60 = vld [vmem:[#allocation5 + $0x40] sm:$0xff]   ;;  %v1634_v1 = vld [vmem:[#allocation5 + $0x48] sm:$0xff]  }
  0x51   : > { %1478 = vmatpush3.bf16.msra.mxu1 %v1612_v9  ;;  %v1635_v4 = vld [vmem:[#allocation5] sm:$0xff]   ;;  %v1636_v5 = vld [vmem:[#allocation5 + $0x50] sm:$0xff]   ;;  %v1637_v6 = vld [vmem:[#allocation5 + $0x8] sm:$0xff]  }
  0x52   : > { %1479 = vmatprep.subr.bf16.mxu1 %v1738_v2  ;;  %v1638_v7 = vld [vmem:[#allocation5 + $0x58] sm:$0xff]   ;;  %v1639_v8 = vld [vmem:[#allocation5 + $0x10] sm:$0xff]   ;;  %v1640_v9 = vld [vmem:[#allocation5 + $0x60] sm:$0xff]  }
  0x53   : > { %1458 = vmatpush3.bf16.msra.mxu0 %v1615_v10  ;;  %v1641_v10 = vld [vmem:[#allocation5 + $0x18] sm:$0xff]   ;;  %v1654_v28 = vld [vmem:[#allocation5 + $0xa8] sm:$0xff]  }
  0x54   : > { %1459 = vmatprep.subr.bf16.mxu0 %v1738_v2 }
  0x55   : > { %1480 = vmatpush3.bf16.msra.mxu1 %v1614_v11  ;;  %v1642_v11 = vld [vmem:[#allocation5 + $0x68] sm:$0xff]  }
  0x56   : > { %1481 = vmatprep.subr.bf16.mxu1 %v1738_v2 }
  0x57   : > { %1460 = vmatpush3.bf16.msra.mxu0 %v1617_v12  ;;  %v1643_v12 = vld [vmem:[#allocation5 + $0x20] sm:$0xff]  }
  0x58   : > { %1461 = vmatprep.subr.bf16.mxu0 %v1738_v2 }
  0x59   : > { %1482 = vmatpush3.bf16.msra.mxu1 %v1616_v13  ;;  %v1644_v13 = vld [vmem:[#allocation5 + $0x70] sm:$0xff]  }
  0x5a   : > { %1483 = vmatprep.subr.bf16.mxu1 %v1738_v2 }
  0x5b   : > { %1462 = vmatpush3.bf16.msra.mxu0 %v1619_v14  ;;  %v1645_v14 = vld [vmem:[#allocation5 + $0x28] sm:$0xff]  }
  0x5c   : > { %1463 = vmatprep.subr.bf16.mxu0 %v1738_v2 }
  0x5d   : > { %1484 = vmatpush3.bf16.msra.mxu1 %v1618_v15  ;;  %v1646_v15 = vld [vmem:[#allocation5 + $0x78] sm:$0xff]  }
  0x5e   : > { %1485 = vmatprep.subr.bf16.mxu1 %v1738_v2 }
  0x5f   : > { %1464 = vmatpush3.bf16.msra.mxu0 %v1621_v16  ;;  %v1647_v16 = vld [vmem:[#allocation5 + $0x30] sm:$0xff]  }
  0x60   : > { %1465 = vmatprep.subr.bf16.mxu0 %v1738_v2 }
  0x61   : > { %1486 = vmatpush3.bf16.msra.mxu1 %v1620_v17  ;;  %v1648_v17 = vld [vmem:[#allocation5 + $0x38] sm:$0xff]  }
  0x62   : > { %1487 = vmatprep.subr.bf16.mxu1 %v1738_v2 }
  0x63   : > { %1466 = vmatpush3.bf16.msra.mxu0 %v1623_v18 }
  0x64   : > { %1467 = vmatprep.subr.bf16.mxu0 %v1738_v2 }
  0x65   : > { %1488 = vmatpush3.bf16.msra.mxu1 %v1622_v19 }
  0x66   : > { %1513 = vmatprep.subr.bf16.mxu1 %v1738_v2 }
  0x67   : > { %1468 = vmatpush3.bf16.msra.mxu0 %v1624_v20 }
  0x68   : > { %1493 = vmatprep.subr.bf16.mxu0 %v1738_v2 }
  0xcd   : > { %v465_v22 = vpop.permute.xlu0 %464 }
  0xce   : > { %v467_v23 = vmul.bf16 %v465_v22, %v461_v21 }
  0xd0   : > { %v1340_v24 = vcombine.low %v467_v23, %v467_v23  ;;  %1490 = vmatmul.mubr.bf16.vlgmr.msra.gmra.mrb[0].mxu1 %v467_v23 }
  0xd1   : > { %1529 = vmatprep.mubr.msk.bf16.mxu1 %vm1739_vm0, %v1738_v2  ;;  %1514 = vmatpush3.bf16.msra.mxu1 %v1635_v4 }
  0xd2   : > { %v489_v25 = vshrl.u32 %v1340_v24, 16  ;;  %v492_v26 = vshll.u32 %v1340_v24, 16  ;;  %1515 = vmatprep.subr.bf16.mxu1 %v1738_v2 }
  0xd4   : > { %v491_v27 = vrot.slane %v489_v25, 7  ;;  %v692_v38 = vrot.slane %v492_v26, 1 }
  0xd5   : > { %1516 = vmatpush3.bf16.msra.mxu1 %v1637_v6 }
  0xd6   : > { %v494_v29 = vor.u32 %v492_v26, %v491_v27  ;;  %v693_v40 = vor.u32 %v692_v38, %v489_v25  ;;  %1517 = vmatprep.subr.bf16.mxu1 %v1738_v2  ;;  %v1366_v25 = vld [vmem:[%s2023_s4] ss:$0 sm:$0xff]  ;;  %v1649_v38 = vld [vmem:[#allocation5 + $0x80] sm:$0xff]  }
  0xd7   : > { %v1367_v27 = vld [vmem:[%s2024_s5] ss:$0 sm:$0xff] }
  0xd8   : > { %v499_v31 = vsel %vm1932_vm3, 0, %v494_v29  ;;  %v698_v42 = vsel %vm1947_vm6, %v693_v40, 0  ;;  %v1650_v40 = vld [vmem:[#allocation5 + $0x88] sm:$0xff]  }
  0xd9   : > { %1470 = vmatmul.mubr.bf16.vlgmr.msra.gmra.mrb[0].mxu0 %v499_v31  ;;  %1518 = vmatpush3.bf16.msra.mxu1 %v1639_v8 }
  0xda   : > { %1494 = vmatpush3.bf16.msra.mxu0 %v1625_v30  ;;  %1509 = vmatprep.mubr.msk.bf16.mxu0 %vm1739_vm0, %v1738_v2 }
  0xdb   : > { %1495 = vmatprep.subr.bf16.mxu0 %v1738_v2  ;;  %1519 = vmatprep.subr.bf16.mxu1 %v1738_v2 }
  0xdd   : > { %1520 = vmatpush3.bf16.msra.mxu1 %v1641_v10 }
  0xde   : > { %1496 = vmatpush3.bf16.msra.mxu0 %v1626_v32  ;;  %1521 = vmatprep.subr.bf16.mxu1 %v1738_v2 }
  0xdf   : > { %1497 = vmatprep.subr.bf16.mxu0 %v1738_v2 }
  0xe1   : > { %1522 = vmatpush3.bf16.msra.mxu1 %v1643_v12 }
  0xe2   : > { %1498 = vmatpush3.bf16.msra.mxu0 %v1627_v33  ;;  %1523 = vmatprep.subr.bf16.mxu1 %v1738_v2 }
  0xe3   : > { %1499 = vmatprep.subr.bf16.mxu0 %v1738_v2 }
  0xe5   : > { %1524 = vmatpush3.bf16.msra.mxu1 %v1645_v14  ;;  %v1393_v14 = vld [vmem:[%s2027_s8] ss:$0 sm:$0xff] }
  0xe6   : > { %1500 = vmatpush3.bf16.msra.mxu0 %v1628_v34  ;;  %1525 = vmatprep.subr.bf16.mxu1 %v1738_v2 }
  0xe7   : > { %1501 = vmatprep.subr.bf16.mxu0 %v1738_v2 }
  0xe9   : > { %1526 = vmatpush3.bf16.msra.mxu1 %v1647_v16  ;;  %v1394_v16 = vld [vmem:[%s2028_s9] ss:$0 sm:$0xff] }
  0xea   : > { %1502 = vmatpush3.bf16.msra.mxu0 %v1629_v35  ;;  %1527 = vmatprep.subr.bf16.mxu1 %v1738_v2 }
  0xeb   : > { %1503 = vmatprep.subr.bf16.mxu0 %v1738_v2 }
  0xed   : > { %1528 = vmatpush3.bf16.msra.mxu1 %v1648_v17 }
  0xee   : > { %1504 = vmatpush3.bf16.msra.mxu0 %v1630_v36  ;;  %1553 = vmatprep.subr.bf16.mxu1 %v1738_v2 }
  0xef   : > { %1505 = vmatprep.subr.bf16.mxu0 %v1738_v2 }
  0xf2   : > { %1506 = vmatpush3.bf16.msra.mxu0 %v1631_v37 }
  0xf3   : > { %1507 = vmatprep.subr.bf16.mxu0 %v1738_v2 }
  0xf6   : > { %1508 = vmatpush3.bf16.msra.mxu0 %v1632_v39 }
  0xf7   : > { %1533 = vmatprep.subr.bf16.mxu0 %v1738_v2 }
  0xf9   : > { %1510 = vmatmul.mubr.bf16.vlgmr.msra.gmra.mrb[4].mxu0 %v698_v42  ;;  %v1651_v42 = vld [vmem:[#allocation5 + $0x90] sm:$0xff]  }
  0xfa   : > { %1549 = vmatprep.mubr.msk.bf16.mxu0 %vm1739_vm0, %v1738_v2  ;;  %1534 = vmatpush3.bf16.msra.mxu0 %v1633_v60 }
  0xfb   : > { %1535 = vmatprep.subr.bf16.mxu0 %v1738_v2 }
  0xfe   : > { %1536 = vmatpush3.bf16.msra.mxu0 %v1634_v1 }
  0xff   : > { %1537 = vmatprep.subr.bf16.mxu0 %v1738_v2 }
 0x102   : > { %1538 = vmatpush3.bf16.msra.mxu0 %v1636_v5 }
 0x103   : > { %1539 = vmatprep.subr.bf16.mxu0 %v1738_v2 }
 0x106   : > { %1540 = vmatpush3.bf16.msra.mxu0 %v1638_v7 }
 0x107   : > { %1541 = vmatprep.subr.bf16.mxu0 %v1738_v2 }
 0x10a   : > { %1542 = vmatpush3.bf16.msra.mxu0 %v1640_v9 }
 0x10b   : > { %1543 = vmatprep.subr.bf16.mxu0 %v1738_v2 }
 0x10e   : > { %1544 = vmatpush3.bf16.msra.mxu0 %v1642_v11 }
 0x10f   : > { %1545 = vmatprep.subr.bf16.mxu0 %v1738_v2 }
 0x112   : > { %1546 = vmatpush3.bf16.msra.mxu0 %v1644_v13 }
 0x113   : > { %1547 = vmatprep.subr.bf16.mxu0 %v1738_v2 }
 0x116   : > { %1548 = vmatpush3.bf16.msra.mxu0 %v1646_v15 }
 0x1a3   : > { %v686_v43 = vpop.f32.mrb[0].mxu1 }
 0x1a4   : > { %v1491_v44 = vpop.f32.mrb[1].mxu1 }
 0x1a5   : > { %v689_v45 = vpop.f32.mrb[2].mxu1  ;;  %v1653_v44 = vld [vmem:[#allocation5 + $0xa0] sm:$0xff]  }
 0x1a6   : > { %v1492_v46 = vpop.f32.mrb[3].mxu1  ;;  %v1655_v45 = vld [vmem:[#allocation5 + $0xb0] sm:$0xff]  }
 0x1ac   : > { %v598_v47 = vpop.f32.mrb[0].mxu0 }
 0x1ad   : > { %v687_v48 = vadd.f32 %v686_v43, %v598_v47  ;;  %v1471_v49 = vpop.f32.mrb[1].mxu0  ;;  %v1652_v43 = vld [vmem:[#allocation5 + $0x98] sm:$0xff]  }
 0x1ae   : > { %v601_v50 = vpop.f32.mrb[2].mxu0  ;;  %v1656_v47 = vld [vmem:[#allocation5 + $0xb8] sm:$0xff]  }
 0x1af   : > { %v1472_v51 = vpop.f32.mrb[3].mxu0 }
 0x1cc   : > { %v798_v52 = vpop.f32.mrb[4].mxu0 }
 0x1cd   : > { %v804_v54 = vadd.f32 %v798_v52, %v687_v48  ;;  %v1511_v55 = vpop.f32.mrb[5].mxu0 }
 0x1ce   : > { %v801_v56 = vpop.f32.mrb[6].mxu0 }
 0x1cf   : > { %v1512_v57 = vpop.f32.mrb[7].mxu0  ;;  %v812_v58 = vadd.f32 %v1365_v53, %v804_v54 }
 0x1d1   : > { %v813_v59 = vmax.f32 %v812_v58, 0.0 }
 0x1d3   : > { %814 = vadd.xlane.f32.xlu0 %v813_v59 }
 0x260   : > { %v815_v61 = vpop.xlane.xlu0 %814 }
 0x261   : > { %v816_v62 = vmul.f32 0.03125, %v815_v61 }
 0x263   : > { %v817_v63 = vsub.f32 %v813_v59, %v816_v62  ;;  %v821_v18 = vmul.f32 %v816_v62, %v816_v62 }
 0x265   : > { %v818_v0 = vmul.f32 %v817_v63, %v817_v63  ;;  %v822_v19 = vmul.f32 96.0, %v821_v18 }
 0x267   : > { %819 = vadd.xlane.f32.xlu1 %v818_v0 }
 0x278   : > { %846 = vperm.xlu1 %1608, %v1902_v3  }
 0x2f4   : > { %v820_v20 = vpop.xlane.xlu1 %819 }
 0x2f5   : > { %v823_v21 = vsub.f32 %v820_v20, %v822_v19  ;;  %v1395_v19 = vld [vmem:[%s2029_s10] ss:$0 sm:$0xff] }
 0x2f7   : > { %v824_v22 = vmul.f32 0.03125, %v823_v21 }
 0x2f8   : > { %v1981_v30 = vpop.permute.xlu1 %846 }
 0x2f9   : > { %v825_v23 = vadd.f32 1e-05, %v824_v22  ;;  %v1396_v22 = vld [vmem:[#allocation2] ss:$0 sm:$0xff] }
 0x2fb   : > { %1657 = vrsqrt.f32 %v825_v23 }
 0x305   : > { %v1658_v24 = vpop.eup %1657 }
 0x306   : > { %v827_v26 = vmul.f32 %v1658_v24, %v817_v63 }
 0x308   : > { %v835_v29 = vmul.f32 %v1366_v25, %v827_v26 }
 0x30a   : > { %v843_v31 = vadd.f32 %v1367_v27, %v835_v29 }
 0x30c   : > { %v849_v32 = vmul.f32 %v1981_v30, %v843_v31 }
 0x30e   : > { %v850_v33 = vpack.c.bf16 %v849_v32, %v849_v32 }
 0x310   : > { %v869_v34 = vshrl.u32 %v850_v33, 16  ;;  %1550 = vmatmul.mubr.bf16.vlgmr.msra.gmra.mrb[8].mxu0 %v850_v33  ;;  %v872_v35 = vshll.u32 %v850_v33, 16 }
 0x312   : > { %v871_v36 = vrot.slane %v869_v34, 7  ;;  %v1069_v46 = vrot.slane %v872_v35, 1 }
 0x314   : > { %v874_v37 = vor.u32 %v872_v35, %v871_v36  ;;  %v1070_v48 = vor.u32 %v1069_v46, %v869_v34 }
 0x316   : > { %v876_v39 = vsel %vm1932_vm3, 0, %v874_v37  ;;  %v1072_v49 = vsel %vm1947_vm6, %v1070_v48, 0 }
 0x317   : > { %1530 = vmatmul.mubr.bf16.vlgmr.msra.gmra.mrb[4].mxu1 %v876_v39 }
 0x318   : > { %1554 = vmatpush3.bf16.msra.mxu1 %v1649_v38  ;;  %1569 = vmatprep.mubr.msk.bf16.mxu1 %vm1739_vm0, %v1738_v2 }
 0x319   : > { %1555 = vmatprep.subr.bf16.mxu1 %v1738_v2 }
 0x31c   : > { %1556 = vmatpush3.bf16.msra.mxu1 %v1650_v40 }
 0x31d   : > { %1557 = vmatprep.subr.bf16.mxu1 %v1738_v2 }
 0x320   : > { %1558 = vmatpush3.bf16.msra.mxu1 %v1651_v42 }
 0x321   : > { %1559 = vmatprep.subr.bf16.mxu1 %v1738_v2 }
 0x324   : > { %1560 = vmatpush3.bf16.msra.mxu1 %v1652_v43 }
 0x325   : > { %1561 = vmatprep.subr.bf16.mxu1 %v1738_v2 }
 0x328   : > { %1562 = vmatpush3.bf16.msra.mxu1 %v1653_v44 }
 0x329   : > { %1563 = vmatprep.subr.bf16.mxu1 %v1738_v2 }
 0x32c   : > { %1564 = vmatpush3.bf16.msra.mxu1 %v1654_v28 }
 0x32d   : > { %1565 = vmatprep.subr.bf16.mxu1 %v1738_v2 }
 0x330   : > { %1566 = vmatpush3.bf16.msra.mxu1 %v1655_v45 }
 0x331   : > { %1567 = vmatprep.subr.bf16.mxu1 %v1738_v2  ;;  %v1392_v2 = vld [vmem:[%s2026_s7] ss:$0 sm:$0xff] }
 0x334   : > { %1568 = vmatpush3.bf16.msra.mxu1 %v1656_v47 }
 0x337   : > { %1570 = vmatmul.mubr.bf16.vlgmr.msra.gmra.mrb[8].mxu1 %v1072_v49 }
 0x3e3   : > { %v1063_v50 = vpop.f32.mrb[8].mxu0 }
 0x3e4   : > { %v1551_v51 = vpop.f32.mrb[9].mxu0 }
 0x3e5   : > { %v1066_v52 = vpop.f32.mrb[10].mxu0 }
 0x3e6   : > { %v1552_v53 = vpop.f32.mrb[11].mxu0 }
 0x3ea   : > { %v975_v54 = vpop.f32.mrb[4].mxu1 }
 0x3eb   : > { %v1064_v55 = vadd.f32 %v1063_v50, %v975_v54  ;;  %v1531_v56 = vpop.f32.mrb[5].mxu1 }
 0x3ec   : > { %v978_v57 = vpop.f32.mrb[6].mxu1 }
 0x3ed   : > { %v1532_v58 = vpop.f32.mrb[7].mxu1 }
 0x40a   : > { %v1172_v59 = vpop.f32.mrb[8].mxu1 }
 0x40b   : > { %v1178_v60 = vadd.f32 %v1172_v59, %v1064_v55  ;;  %v1571_v61 = vpop.f32.mrb[9].mxu1 }
 0x40c   : > { %v1175_v62 = vpop.f32.mrb[10].mxu1 }
 0x40d   : > { %v1572_v41 = vpop.f32.mrb[11].mxu1  ;;  %v1186_v63 = vadd.f32 %v1392_v2, %v1178_v60 }
 0x40f   : > { %v1187_v0 = vmax.f32 %v1186_v63, 0.0 }
 0x411   : > { %1188 = vadd.xlane.f32.xlu1 %v1187_v0 }
 0x49e   : > { %v1189_v1 = vpop.xlane.xlu1 %1188 }
 0x49f   : > { %v1190_v4 = vmul.f32 0.03125, %v1189_v1 }
 0x4a1   : > { %v1191_v5 = vsub.f32 %v1187_v0, %v1190_v4  ;;  %v1195_v7 = vmul.f32 %v1190_v4, %v1190_v4 }
 0x4a3   : > { %v1192_v6 = vmul.f32 %v1191_v5, %v1191_v5  ;;  %v1196_v8 = vmul.f32 96.0, %v1195_v7 }
 0x4a5   : > { %1193 = vadd.xlane.f32.xlu0 %v1192_v6 }
 0x532   : > { %v1194_v9 = vpop.xlane.xlu0 %1193 }
 0x533   : > { %v1197_v10 = vsub.f32 %v1194_v9, %v1196_v8 }
 0x535   : > { %v1198_v11 = vmul.f32 0.03125, %v1197_v10 }
 0x537   : > { %v1199_v12 = vadd.f32 1e-05, %v1198_v11 }
 0x539   : > { %1659 = vrsqrt.f32 %v1199_v12 }
 0x543   : > { %v1660_v13 = vpop.eup %1659 }
 0x544   : > { %v1201_v15 = vmul.f32 %v1660_v13, %v1191_v5 }
 0x546   : > { %v1209_v17 = vmul.f32 %v1393_v14, %v1201_v15 }
 0x548   : > { %v1217_v18 = vadd.f32 %v1394_v16, %v1209_v17 }
 0x54a   : > { %v1218_v20 = vmul.f32 %v1217_v18, %v1981_v30 }
 0x54c   : > { %v1226_v21 = vmul.f32 %v1395_v19, %v1218_v20 }
 0x54e   : > { %1227 = vadd.xlane.f32.xlu0 %v1226_v21 }
 0x5db   : > { %v1228_v23 = vpop.xlane.xlu0 %1227 }
 0x5dc   : > { %v1236_v24 = vadd.f32 %v1396_v22, %v1228_v23 }
 0x5de   : > { %v1238_v25 = vsel %vm1237_vm7, %v1236_v24, -inf }
 0x5df   : > { %1240 = vst.msk [vmem:[%s457_s30] sm:$0xff] %vm1239_vm8, %v1238_v25 }
 0x5e0 PF: > { %s26_s23 = sadd.s32 1, %s1731_s23  }
 0x5e1   : > { %p23_p5 = scmp.ge.s32.totalorder %s26_s23, 4  }
 0x5e3   :  { %25 = sbr.rel (!%p23_p5) target bundleno = 5 (0x5), region = 114 }
 0x5ea   :  { %1260 = vsyncpa [#allocation4], 1 }
 0x5eb   :  { %1262 = vsyncpa [#allocation4 + $0x1], 1 }
 0x5ec   :  { %1263 = vsyncpa [#allocation6], 1 }

</bundles_post_ra>
